<compile_context>
chip_gen: v5e
topology: v5e:2x2
jax: 0.10.0
libtpu: 0.0.40
codegen_flags: <defaults>
</compile_context>

<pallas_src>
import functools
import math
from typing import NamedTuple

import jax
import jax.numpy as jnp
from jax import lax
from jax.experimental import pallas as pl
from jax.experimental.pallas import tpu as pltpu

_LANE = 128
_SUBLANE = 8
_NEG_BIG = -1e30
_VMEM_LIMIT = 32 * 1024 * 1024  # safe on v5e/v6e (128 MiB) and v7x (64 MiB physical)


def _round_up(x, m):
    return ((x + m - 1) // m) * m


class PreparedActorParams(NamedTuple):
    """Zero-padded, MXU-ready parameters (padding/casting hoisted out of the hot path)."""
    w1: jax.Array   # [S, H]  bf16
    b1: jax.Array   # [1, H]  f32
    w2: jax.Array   # [H, H]  bf16
    b2: jax.Array   # [1, H]  f32
    wp: jax.Array   # [H, A]  bf16
    bp: jax.Array   # [1, A]  f32
    state_dim: int
    net_width: int
    action_dim: int


def prepare_actor_params(params):
    """Pad weights to lane-dense shapes and cast to bf16 once (call outside the hot loop)."""
    state_dim, net_width = params["w1"].shape
    action_dim = params["wp"].shape[1]
    S = state_dim
    H = _round_up(net_width, _LANE)
    A = _round_up(action_dim, _LANE)

    def pad2(a, r, c):
        a = jnp.asarray(a, jnp.float32)
        if a.ndim == 1:
            a = a.reshape(1, -1)
        return jnp.pad(a, ((0, r - a.shape[0]), (0, c - a.shape[1])))

    return PreparedActorParams(
        w1=pad2(params["w1"], S, H).astype(jnp.bfloat16),
        b1=pad2(params["b1"], 1, H),
        w2=pad2(params["w2"], H, H).astype(jnp.bfloat16),
        b2=pad2(params["b2"], 1, H),
        wp=pad2(params["wp"], H, A).astype(jnp.bfloat16),
        bp=pad2(params["bp"], 1, A),
        state_dim=state_dim, net_width=net_width, action_dim=action_dim)


# ----------------------------- kernels ------------------------------------


def _mlp_logits(state_ref, w1_ref, b1_ref, w2_ref, b2_ref, wp_ref, bp_ref):
    """fc1+tanh -> fc2+tanh -> pi.  bf16 MXU matmuls, f32 accumulation/activations."""
    x = state_ref[...].astype(jnp.bfloat16)
    h = jnp.tanh(
        jnp.dot(x, w1_ref[...], preferred_element_type=jnp.float32) + b1_ref[...])
    # TODO(synk): on v6e/v7x the tanh could run in bf16 (bf16 EUP); kept f32 so the
    # same kernel is correct/fast on v5e (no bf16 VPU/EUP).
    h = jnp.tanh(
        jnp.dot(h.astype(jnp.bfloat16), w2_ref[...],
                preferred_element_type=jnp.float32) + b2_ref[...])
    return (jnp.dot(h.astype(jnp.bfloat16), wp_ref[...],
                    preferred_element_type=jnp.float32) + bp_ref[...])


def _mlp_rowsoftmax_kernel(state_ref, w1_ref, b1_ref, w2_ref, b2_ref,
                           wp_ref, bp_ref, prob_ref, *, action_dim):
    """Fused MLP + softmax over the action (last) axis; stores unpadded columns."""
    logits = _mlp_logits(state_ref, w1_ref, b1_ref, w2_ref, b2_ref, wp_ref, bp_ref)
    # Mask padded action lanes so they don't contribute to the row softmax.
    col = lax.broadcasted_iota(jnp.int32, logits.shape, 1)
    logits = jnp.where(col < action_dim, logits, _NEG_BIG)
    m = jnp.max(logits, axis=-1, keepdims=True)
    e = jnp.exp(logits - m)
    denom = jnp.sum(e, axis=-1, keepdims=True)
    prob = e / denom  # exact normalization (rows must sum to 1)
    prob_ref[...] = prob[:, :action_dim].astype(prob_ref.dtype)


def _mlp_colstats_kernel(state_ref, w1_ref, b1_ref, w2_ref, b2_ref,
                         wp_ref, bp_ref, m_ref, l_ref, *, batch, block_batch):
    """Pass 1 of the dim=0 softmax: per-batch-tile column (max, sum-exp) stats.

    No logits are written to HBM; they are recomputed in pass 2 (weights are
    VMEM-resident, recompute is cheaper than the write+read round trip).
    """
    step = pl.program_id(0)
    logits = _mlp_logits(state_ref, w1_ref, b1_ref, w2_ref, b2_ref, wp_ref, bp_ref)
    # Mask padded batch rows out of the column-wise reduction.
    row = step * block_batch + lax.broadcasted_iota(jnp.int32, logits.shape, 0)
    masked = jnp.where(row < batch, logits, _NEG_BIG)
    m = jnp.max(masked, axis=0, keepdims=True)            # (1, A)
    l = jnp.sum(jnp.exp(masked - m), axis=0, keepdims=True)
    m_ref[...] = m
    l_ref[...] = l


def _mlp_colnorm_kernel(state_ref, w1_ref, b1_ref, w2_ref, b2_ref,
                        wp_ref, bp_ref, m_ref, l_ref, prob_ref, *, action_dim):
    """Pass 2 of the dim=0 softmax: recompute the MLP and normalize each tile."""
    logits = _mlp_logits(state_ref, w1_ref, b1_ref, w2_ref, b2_ref, wp_ref, bp_ref)
    prob = jnp.exp(logits - m_ref[...]) / l_ref[...]       # exact normalization
    prob_ref[...] = prob[:, :action_dim].astype(prob_ref.dtype)


# ----------------------------- wrapper -------------------------------------


def actor_forward(state, params, dim: int = 0, block_batch: int = 1024):
    """Actor forward pass.

    state:  [batch, state_dim] float32
    params: raw dict {w1,b1,w2,b2,wp,bp} or a PreparedActorParams
    dim:    softmax axis (0 = batch axis, PyTorch module default; 1/-1 = actions)
    returns prob: [batch, action_dim] float32
    """
    if dim not in (0, 1, -1):
        raise ValueError(f"softmax dim must be 0, 1 or -1 for 2-D input, got {dim}")
    assert state.ndim == 2, "expected state of shape [batch, state_dim]"

    prepared = (params if isinstance(params, PreparedActorParams)
                else prepare_actor_params(params))
    batch, state_dim = state.shape
    assert state_dim == prepared.state_dim
    action_dim = prepared.action_dim
    S = state_dim
    H = prepared.w1.shape[1]
    A = prepared.wp.shape[1]

    # Batch tiling: tile is a multiple of 8 sublanes; pad batch to a tile multiple.
    bb = max(_SUBLANE, min(block_batch, _round_up(batch, _SUBLANE)))
    bb = _round_up(bb, _SUBLANE)
    batch_pad = _round_up(batch, bb)
    n_tiles = batch_pad // bb

    x = state.astype(jnp.float32)
    if batch_pad != batch:
        x = jnp.pad(x, ((0, batch_pad - batch), (0, 0)))

    state_spec = pl.BlockSpec((bb, S), lambda i: (i, 0))
    prob_spec = pl.BlockSpec((bb, action_dim), lambda i: (i, 0))   # unpadded output

    def const(shape):
        # Constant index_map -> weights/biases stay VMEM-resident across the grid.
        # TODO(synk): pl.Buffered(1) would drop their second pipeline buffer; only
        # worth it for much larger net_width, so left at the default here.
        return pl.BlockSpec(shape, lambda i: (0, 0))

    w_specs = [const((S, H)), const((1, H)),
               const((H, H)), const((1, H)),
               const((H, A)), const((1, A))]
    weights = (prepared.w1, prepared.b1, prepared.w2, prepared.b2,
               prepared.wp, prepared.bp)

    cparams = pltpu.CompilerParams(
        dimension_semantics=("parallel",), vmem_limit_bytes=_VMEM_LIMIT)

    if dim in (1, -1):
        # Per-row softmax over actions: tile-local, batch axis fully parallel.
        kernel = functools.partial(_mlp_rowsoftmax_kernel, action_dim=action_dim)
        prob_pad = pl.pallas_call(
            kernel,
            out_shape=jax.ShapeDtypeStruct((batch_pad, action_dim), jnp.float32),
            grid=(n_tiles,),
            in_specs=[state_spec] + w_specs,
            out_specs=prob_spec,
            compiler_params=cparams,
        )(x, *weights)
        return prob_pad[:batch]

    # dim == 0: softmax over the batch axis (cross-tile reduction -> two passes).
    # Pass 1 (parallel): per-tile column stats only, no logits round-trip.
    stats_kernel = functools.partial(_mlp_colstats_kernel, batch=batch, block_batch=bb)
    stat_spec = pl.BlockSpec((1, A), lambda i: (i, 0))
    m_tiles, l_tiles = pl.pallas_call(
        stats_kernel,
        out_shape=(jax.ShapeDtypeStruct((n_tiles, A), jnp.float32),
                   jax.ShapeDtypeStruct((n_tiles, A), jnp.float32)),
        grid=(n_tiles,),
        in_specs=[state_spec] + w_specs,
        out_specs=(stat_spec, stat_spec),
        compiler_params=cparams,
    )(x, *weights)

    # Tiny cross-tile logsumexp combine ((n_tiles, A) -> (1, A)) in plain JAX.
    m = jnp.max(m_tiles, axis=0, keepdims=True)
    l = jnp.sum(l_tiles * jnp.exp(m_tiles - m), axis=0, keepdims=True)

    # Pass 2 (parallel): recompute the MLP (weights VMEM-resident) and normalize.
    norm_kernel = functools.partial(_mlp_colnorm_kernel, action_dim=action_dim)
    prob_pad = pl.pallas_call(
        norm_kernel,
        out_shape=jax.ShapeDtypeStruct((batch_pad, action_dim), jnp.float32),
        grid=(n_tiles,),
        in_specs=[state_spec] + w_specs + [const((1, A)), const((1, A))],
        out_specs=prob_spec,
        compiler_params=cparams,
    )(x, *weights, m, l)
    return prob_pad[:batch]


def init_actor_params(key, state_dim, net_width, action_dim):
    """Deterministic init mimicking torch.nn.Linear default U(-1/sqrt(fan_in), ...)."""
    # TODO(synk): the Adam optimizer attached to the torch module is training-time
    # host-side state; it is not part of the forward pass and is not translated.
    def linear_init(k, fan_in, fan_out):
        kw, kb = jax.random.split(k)
        bound = 1.0 / math.sqrt(fan_in)
        w = jax.random.uniform(kw, (fan_in, fan_out), jnp.float32, -bound, bound)
        b = jax.random.uniform(kb, (1, fan_out), jnp.float32, -bound, bound)
        return w, b

    k1, k2, k3 = jax.random.split(key, 3)
    w1, b1 = linear_init(k1, state_dim, net_width)
    w2, b2 = linear_init(k2, net_width, net_width)
    wp, bp = linear_init(k3, net_width, action_dim)
    return {"w1": w1, "b1": b1, "w2": w2, "b2": b2, "wp": wp, "bp": bp}


if __name__ == "__main__":
    state_dim, action_dim, net_width, batch = 8, 4, 32, 8

    key = jax.random.PRNGKey(0)
    k_params, k_state = jax.random.split(key)
    params = init_actor_params(k_params, state_dim, net_width, action_dim)
    state = jax.random.normal(k_state, (batch, state_dim), dtype=jnp.float32)

    # Pad / cast weights once (hoisted out of the per-call hot path).
    prepared = prepare_actor_params(params)

    # Default dim=0 (matches the PyTorch module's default softmax axis).
    prob0 = jax.block_until_ready(actor_forward(state, prepared, dim=0))
    assert prob0.shape == (batch, action_dim)
    assert bool(jnp.all(jnp.abs(jnp.sum(prob0, axis=0) - 1.0) < 1e-3))

    # Per-row softmax (dim=-1), the usual Actor semantics; tile-local fused path.
    prob1 = jax.block_until_ready(actor_forward(state, prepared, dim=-1))
    assert prob1.shape == (batch, action_dim)
    assert bool(jnp.all(jnp.abs(jnp.sum(prob1, axis=1) - 1.0) < 1e-3))

    # Loose check vs a pure-JAX f32 reference (bf16 matmuls inside the kernel).
    def ref(s, p, axis):
        h = jnp.tanh(s @ p["w1"] + p["b1"])
        h = jnp.tanh(h @ p["w2"] + p["b2"])
        return jax.nn.softmax(h @ p["wp"] + p["bp"], axis=axis)

    assert bool(jnp.max(jnp.abs(prob0 - ref(state, params, 0))) < 5e-2)
    assert bool(jnp.max(jnp.abs(prob1 - ref(state, params, 1))) < 5e-2)

    print("KERNEL_OK")
</pallas_src>

<mosaic_0001>
module attributes {stable_mosaic.version = 11 : i64} {
  func.func @_mlp_colstats_kernel(%arg0: i32, %arg1: memref<8x8xf32, #tpu.memory_space<vmem>>, %arg2: memref<8x128xbf16, #tpu.memory_space<vmem>>, %arg3: memref<1x128xf32, #tpu.memory_space<vmem>>, %arg4: memref<128x128xbf16, #tpu.memory_space<vmem>>, %arg5: memref<1x128xf32, #tpu.memory_space<vmem>>, %arg6: memref<128x128xbf16, #tpu.memory_space<vmem>>, %arg7: memref<1x128xf32, #tpu.memory_space<vmem>>, %arg8: memref<1x128xf32, #tpu.memory_space<vmem>>, %arg9: memref<1x128xf32, #tpu.memory_space<vmem>>) attributes {dimension_semantics = [#tpu.dimension_semantics<parallel>], iteration_bounds = array<i64: 1>, scalar_prefetch = 0 : i64, scratch_operands = 0 : i64, tpu.core_type = #tpu.core_type<tc>, window_params = [{transform_indices = @transform_0, window_bounds = array<i64: 8, 8>}, {pipeline_mode = #tpu.pipeline_mode<synchronous>, transform_indices = @transform_1, window_bounds = array<i64: 8, 128>}, {pipeline_mode = #tpu.pipeline_mode<synchronous>, transform_indices = @transform_2, window_bounds = array<i64: 1, 128>}, {pipeline_mode = #tpu.pipeline_mode<synchronous>, transform_indices = @transform_3, window_bounds = array<i64: 128, 128>}, {pipeline_mode = #tpu.pipeline_mode<synchronous>, transform_indices = @transform_4, window_bounds = array<i64: 1, 128>}, {pipeline_mode = #tpu.pipeline_mode<synchronous>, transform_indices = @transform_5, window_bounds = array<i64: 128, 128>}, {pipeline_mode = #tpu.pipeline_mode<synchronous>, transform_indices = @transform_6, window_bounds = array<i64: 1, 128>}, {transform_indices = @transform_7, window_bounds = array<i64: 1, 128>}, {transform_indices = @transform_8, window_bounds = array<i64: 1, 128>}]} {
    %c0 = arith.constant 0 : index
    %c0_0 = arith.constant 0 : index
    %0 = vector.load %arg1[%c0, %c0_0] : memref<8x8xf32, #tpu.memory_space<vmem>>, vector<8x8xf32>
    %1 = arith.truncf %0 : vector<8x8xf32> to vector<8x8xbf16>
    %c0_1 = arith.constant 0 : index
    %c0_2 = arith.constant 0 : index
    %2 = vector.load %arg2[%c0_1, %c0_2] : memref<8x128xbf16, #tpu.memory_space<vmem>>, vector<8x128xbf16>
    %cst = arith.constant dense<0.000000e+00> : vector<8x128xf32>
    %3 = tpu.matmul %1, %2, %cst {dimension_numbers = #tpu.dot_dimension_numbers<[1], [0], [0], [1], [0, 0, 1, 1], [], []>} : vector<8x8xbf16>, vector<8x128xbf16>, vector<8x128xf32> -> vector<8x128xf32>
    %c0_3 = arith.constant 0 : index
    %c0_4 = arith.constant 0 : index
    %4 = vector.load %arg3[%c0_3, %c0_4] : memref<1x128xf32, #tpu.memory_space<vmem>>, vector<1x128xf32>
    %5 = vector.broadcast %4 : vector<1x128xf32> to vector<8x128xf32>
    %6 = arith.addf %3, %5 : vector<8x128xf32>
    %7 = math.tanh %6 : vector<8x128xf32>
    %8 = arith.truncf %7 : vector<8x128xf32> to vector<8x128xbf16>
    %c0_5 = arith.constant 0 : index
    %c0_6 = arith.constant 0 : index
    %9 = vector.load %arg4[%c0_5, %c0_6] : memref<128x128xbf16, #tpu.memory_space<vmem>>, vector<128x128xbf16>
    %cst_7 = arith.constant dense<0.000000e+00> : vector<8x128xf32>
    %10 = tpu.matmul %8, %9, %cst_7 {dimension_numbers = #tpu.dot_dimension_numbers<[1], [0], [0], [1], [0, 0, 1, 1], [], []>} : vector<8x128xbf16>, vector<128x128xbf16>, vector<8x128xf32> -> vector<8x128xf32>
    %c0_8 = arith.constant 0 : index
    %c0_9 = arith.constant 0 : index
    %11 = vector.load %arg5[%c0_8, %c0_9] : memref<1x128xf32, #tpu.memory_space<vmem>>, vector<1x128xf32>
    %12 = vector.broadcast %11 : vector<1x128xf32> to vector<8x128xf32>
    %13 = arith.addf %10, %12 : vector<8x128xf32>
    %14 = math.tanh %13 : vector<8x128xf32>
    %15 = arith.truncf %14 : vector<8x128xf32> to vector<8x128xbf16>
    %c0_10 = arith.constant 0 : index
    %c0_11 = arith.constant 0 : index
    %16 = vector.load %arg6[%c0_10, %c0_11] : memref<128x128xbf16, #tpu.memory_space<vmem>>, vector<128x128xbf16>
    %cst_12 = arith.constant dense<0.000000e+00> : vector<8x128xf32>
    %17 = tpu.matmul %15, %16, %cst_12 {dimension_numbers = #tpu.dot_dimension_numbers<[1], [0], [0], [1], [0, 0, 1, 1], [], []>} : vector<8x128xbf16>, vector<128x128xbf16>, vector<8x128xf32> -> vector<8x128xf32>
    %c0_13 = arith.constant 0 : index
    %c0_14 = arith.constant 0 : index
    %18 = vector.load %arg7[%c0_13, %c0_14] : memref<1x128xf32, #tpu.memory_space<vmem>>, vector<1x128xf32>
    %19 = vector.broadcast %18 : vector<1x128xf32> to vector<8x128xf32>
    %20 = arith.addf %17, %19 : vector<8x128xf32>
    %c8_i32 = arith.constant 8 : i32
    %21 = arith.muli %arg0, %c8_i32 : i32
    %22 = tpu.iota {dimensions = array<i32: 0>} : vector<8x128xi32>
    %23 = vector.broadcast %21 : i32 to vector<8x128xi32>
    %24 = arith.addi %23, %22 : vector<8x128xi32>
    %c8_i32_15 = arith.constant 8 : i32
    %25 = vector.broadcast %c8_i32_15 : i32 to vector<8x128xi32>
    %26 = arith.cmpi slt, %24, %25 : vector<8x128xi32>
    %cst_16 = arith.constant -1.000000e+30 : f32
    %27 = vector.broadcast %cst_16 : f32 to vector<8x128xf32>
    %28 = arith.select %26, %20, %27 : vector<8x128xi1>, vector<8x128xf32>
    %cst_17 = arith.constant dense<0xFF800000> : vector<128xf32>
    %29 = vector.multi_reduction <maximumf>, %28, %cst_17 [0] : vector<8x128xf32> to vector<128xf32>
    %30 = vector.shape_cast %29 : vector<128xf32> to vector<1x128xf32>
    %31 = vector.broadcast %30 : vector<1x128xf32> to vector<8x128xf32>
    %32 = arith.subf %28, %31 : vector<8x128xf32>
    %33 = math.exp %32 : vector<8x128xf32>
    %cst_18 = arith.constant dense<0.000000e+00> : vector<128xf32>
    %34 = vector.multi_reduction <add>, %33, %cst_18 [0] : vector<8x128xf32> to vector<128xf32>
    %35 = vector.shape_cast %34 : vector<128xf32> to vector<1x128xf32>
    %c0_19 = arith.constant 0 : index
    %c0_20 = arith.constant 0 : index
    %36 = vector.load %arg8[%c0_19, %c0_20] : memref<1x128xf32, #tpu.memory_space<vmem>>, vector<1x128xf32>
    tpu.vector_store %arg8[%c0_19, %c0_20], %30 {strides = array<i32>} : memref<1x128xf32, #tpu.memory_space<vmem>>, vector<1x128xf32>,
    %c0_21 = arith.constant 0 : index
    %c0_22 = arith.constant 0 : index
    %37 = vector.load %arg9[%c0_21, %c0_22] : memref<1x128xf32, #tpu.memory_space<vmem>>, vector<1x128xf32>
    tpu.vector_store %arg9[%c0_21, %c0_22], %35 {strides = array<i32>} : memref<1x128xf32, #tpu.memory_space<vmem>>, vector<1x128xf32>,
    return
  }
  func.func @transform_0(%arg0: i32) -> (i32, i32) {
    %c0_i32 = arith.constant 0 : i32
    %c0_i32_0 = arith.constant 0 : i32
    return %arg0, %c0_i32 : i32, i32
  }
  func.func @transform_1(%arg0: i32) -> (i32, i32) {
    %c0_i32 = arith.constant 0 : i32
    %c0_i32_0 = arith.constant 0 : i32
    %c0_i32_1 = arith.constant 0 : i32
    return %c0_i32, %c0_i32_0 : i32, i32
  }
  func.func @transform_2(%arg0: i32) -> (i32, i32) {
    %c0_i32 = arith.constant 0 : i32
    %c0_i32_0 = arith.constant 0 : i32
    %c0_i32_1 = arith.constant 0 : i32
    return %c0_i32, %c0_i32_0 : i32, i32
  }
  func.func @transform_3(%arg0: i32) -> (i32, i32) {
    %c0_i32 = arith.constant 0 : i32
    %c0_i32_0 = arith.constant 0 : i32
    %c0_i32_1 = arith.constant 0 : i32
    return %c0_i32, %c0_i32_0 : i32, i32
  }
  func.func @transform_4(%arg0: i32) -> (i32, i32) {
    %c0_i32 = arith.constant 0 : i32
    %c0_i32_0 = arith.constant 0 : i32
    %c0_i32_1 = arith.constant 0 : i32
    return %c0_i32, %c0_i32_0 : i32, i32
  }
  func.func @transform_5(%arg0: i32) -> (i32, i32) {
    %c0_i32 = arith.constant 0 : i32
    %c0_i32_0 = arith.constant 0 : i32
    %c0_i32_1 = arith.constant 0 : i32
    return %c0_i32, %c0_i32_0 : i32, i32
  }
  func.func @transform_6(%arg0: i32) -> (i32, i32) {
    %c0_i32 = arith.constant 0 : i32
    %c0_i32_0 = arith.constant 0 : i32
    %c0_i32_1 = arith.constant 0 : i32
    return %c0_i32, %c0_i32_0 : i32, i32
  }
  func.func @transform_7(%arg0: i32) -> (i32, i32) {
    %c0_i32 = arith.constant 0 : i32
    %c0_i32_0 = arith.constant 0 : i32
    return %arg0, %c0_i32 : i32, i32
  }
  func.func @transform_8(%arg0: i32) -> (i32, i32) {
    %c0_i32 = arith.constant 0 : i32
    %c0_i32_0 = arith.constant 0 : i32
    return %arg0, %c0_i32 : i32, i32
  }
}

</mosaic_0001>

<bundles_post_ra>
// kernel: tpu_custom_call.1
= control target key start
LH: loop header
LB: loop body
LE: loop exit
PB: predicated region body
PF: predicated region fallthrough
CT: control target
= control target key end

     0   :  { %14 = vsyncpa [#allocation3], 0  ;;  %s675_s0 = inlined_call_operand.hbm [shape: f32[8,8], index: 0, kind: input, shape index: {}]   ;;  %s676_s1 = inlined_call_operand.hbm [shape: bf16[8,128], index: 1, kind: input, shape index: {}]   ;;  %s677_s2 = inlined_call_operand.vmem [shape: f32[1,128], index: 2, kind: input, shape index: {}]   ;;  %s678_s3 = inlined_call_operand.hbm [shape: bf16[128,128], index: 3, kind: input, shape index: {}]   ;;  %s679_s4 = inlined_call_operand.vmem [shape: f32[1,128], index: 4, kind: input, shape index: {}]   ;;  %s680_s5 = inlined_call_operand.hbm [shape: bf16[128,128], index: 5, kind: input, shape index: {}]   ;;  %s681_s6 = inlined_call_operand.vmem [shape: f32[1,128], index: 6, kind: input, shape index: {}]   ;;  %s682_s7 = inlined_call_operand.hbm [shape: f32[1,128], index: 7, kind: output, shape index: {0}]   ;;  %s683_s8 = inlined_call_operand.hbm [shape: f32[1,128], index: 8, kind: output, shape index: {1}]  }
   0x1   :  { %15 = vsyncpa [#allocation6], 0 }
   0x2   :  { %16 = vsyncpa [#allocation9], 0 }
   0x3   :  { %17 = vsyncpa [#allocation4], 0  ;;  %s35_s29 = sshll.u32 %s676_s1, 4  ;;  %s36_s29 = int_to_ptr.hbm [resolvable:$true] %s35_s29 }
   0x4   :  { %18 = vsyncpa [#allocation12], 0  ;;  %s595_s30 = smov [#allocation5]   ;;  %s24_s12 = sshll.u32 %s675_s0, 4  ;;  %s25_s12 = int_to_ptr.hbm [resolvable:$true] %s24_s12 }
   0x5   :  { %s37_s9 = sshll.u32 %s595_s30, 4  ;;  %s596_s13 = smov [#allocation2]   ;;  %s38_s9 = int_to_ptr.vmem [resolvable:$true] %s37_s9 }
   0x6   :  { %40 = dma.hbm_to_vmem [thread:$0]  %s36_s29, 64, %s38_s9, [#allocation6]  }
   0x7   :  { %s26_s14 = sshll.u32 %s596_s13, 4  ;;  %s47_s17 = sshll.u32 %s678_s3, 4  ;;  %s27_s14 = int_to_ptr.vmem [resolvable:$true] %s26_s14  ;;  %s48_s17 = int_to_ptr.hbm [resolvable:$true] %s47_s17 }
   0x8   :  { %29 = dma.hbm_to_vmem [thread:$0]  %s25_s12, 128, %s27_s14, [#allocation3]  }
   0x9   :  { %s597_s1 = smov [#allocation7]   ;;  %s62_s21 = sshll.u32 %s680_s5, 4  ;;  %s63_s21 = int_to_ptr.hbm [resolvable:$true] %s62_s21 }
   0xa   :  { %s49_s18 = sshll.u32 %s597_s1, 4  ;;  %s598_s22 = smov 64   ;;  %s50_s18 = int_to_ptr.vmem [resolvable:$true] %s49_s18 }
   0xb   :  { %s599_s0 = smov 4   ;;  %s600_s23 = smov [#allocation8]  }
   0xc   :  { %55 = dma.hbm_to_vmem [thread:$0]  %s48_s17, 1024, %s50_s18, [#allocation6], %s598_s22, %s598_s22, %s599_s0  }
   0xd   :  { %s64_s24 = sshll.u32 %s600_s23, 4  ;;  %s65_s24 = int_to_ptr.vmem [resolvable:$true] %s64_s24 }
   0xe   :  { %70 = dma.hbm_to_vmem [thread:$0]  %s63_s21, 1024, %s65_s24, [#allocation9], %s598_s22, %s598_s22, %s599_s0  }
   0xf   :  { %585 = dma.done.wait [#allocation3], 128  }
  0x10   :  { %586 = vsyncadd [#allocation3], 4294967168 }
  0x11   :  { %587 = dma.done.wait [#allocation6], 1088  }
  0x12   :  { %588 = vsyncadd [#allocation6], 4294966208 }
  0x13   :  { %589 = dma.done.wait [#allocation9], 1024  }
  0x14   :  { %590 = vsyncadd [#allocation9], 4294966272  ;;  %vm101_vm0 = vcmask 1043456   ;;  %v92_v0 = vld [vmem:[#allocation5] sm:$0xf]  ;;  %v90_v1 = vld [vmem:[#allocation2] sm:$0xff] }
  0x15   :  { %v415_v2 = vld [vmem:[#allocation7 + $0x38] sm:$0xff]  ;;  %v103_v3 = vsel %vm101_vm0, %v92_v0, 0  ;;  %v91_v4 = vpack.c.bf16 %v90_v1, %v90_v1  ;;  %vm97_vm1 = vcmask 64512   ;;  %v414_v5 = vld [vmem:[#allocation7 + $0x30] sm:$0xff]  ;;  %v413_v6 = vld [vmem:[#allocation7 + $0x28] sm:$0xff]  ;;  %s601_s28 = smov [#allocation10]  }
  0x16   :  { %112 = vmatpush.bf16.msra.mxu0 %v103_v3  ;;  %188 = vmatpush.bf16.msra.mxu1 %v415_v2  ;;  %v412_v7 = vld [vmem:[#allocation7 + $0x20] sm:$0xff]  ;;  %v411_v8 = vld [vmem:[#allocation7 + $0x18] sm:$0xff]  ;;  %v410_v9 = vld [vmem:[#allocation7 + $0x10] sm:$0xff]  ;;  %s315_s9 = sshll.u32 %s682_s7, 4  ;;  %s326_s7 = sshll.u32 %s683_s8, 4  ;;  %s316_s9 = int_to_ptr.hbm [resolvable:$true] %s315_s9  ;;  %s327_s7 = int_to_ptr.hbm [resolvable:$true] %s326_s7 }
  0x17   :  { %v409_v10 = vld [vmem:[#allocation7 + $0x8] sm:$0xff]  ;;  %v408_v11 = vld [vmem:[#allocation7] sm:$0xff]  ;;  %v423_v12 = vld [vmem:[#allocation8 + $0x38] sm:$0xff] }
  0x18   :  { %271 = vmatpush.bf16.msra.mxu2 %v423_v12  ;;  %v422_v13 = vld [vmem:[#allocation8 + $0x30] sm:$0xff]  ;;  %v421_v14 = vld [vmem:[#allocation8 + $0x28] sm:$0xff]  ;;  %v420_v15 = vld [vmem:[#allocation8 + $0x20] sm:$0xff] }
  0x19   :  { %343 = vmatmul.msk.bf16.vlgmr.msra.gmra.mxu0 %vm97_vm1, %v91_v4  ;;  %v419_v16 = vld [vmem:[#allocation8 + $0x18] sm:$0xff]  ;;  %v432_v17 = vld [vmem:[%s677_s2] ss:$0 sm:$0xff]  ;;  %v417_v24 = vld [vmem:[#allocation8 + $0x8] sm:$0xff] }
  0x1a   :  { %189 = vmatpush.bf16.msra.mxu1 %v414_v5  ;;  %v418_v23 = vld [vmem:[#allocation8 + $0x10] sm:$0xff]  ;;  %v416_v25 = vld [vmem:[#allocation8] sm:$0xff] }
  0x1b   :  { %v433_v26 = vld [vmem:[%s679_s4] ss:$0 sm:$0xff]  ;;  %s313_s4 = sshll.u32 %s601_s28, 4  ;;  %s314_s4 = int_to_ptr.vmem [resolvable:$true] %s313_s4 }
  0x1c   :  { %272 = vmatpush.bf16.msra.mxu2 %v422_v13  ;;  %v434_v32 = vld [vmem:[%s681_s6] ss:$0 sm:$0xff]  ;;  %s602_s6 = smov [#allocation11]  }
  0x1d   :  { %s324_s10 = sshll.u32 %s602_s6, 4  ;;  %s325_s10 = int_to_ptr.vmem [resolvable:$true] %s324_s10 }
  0x1e   :  { %190 = vmatpush.bf16.msra.mxu1 %v413_v6 }
  0x20   :  { %273 = vmatpush.bf16.msra.mxu2 %v421_v14 }
  0x22   :  { %191 = vmatpush.bf16.msra.mxu1 %v412_v7 }
  0x24   :  { %274 = vmatpush.bf16.msra.mxu2 %v420_v15 }
  0x26   :  { %192 = vmatpush.bf16.msra.mxu1 %v411_v8 }
  0x28   :  { %275 = vmatpush.bf16.msra.mxu2 %v419_v16 }
  0x2a   :  { %193 = vmatpush.bf16.msra.mxu1 %v410_v9 }
  0x2c   :  { %276 = vmatpush.bf16.msra.mxu2 %v418_v23 }
  0x2e   :  { %194 = vmatpush.bf16.msra.mxu1 %v409_v10 }
  0x30   :  { %277 = vmatpush.bf16.msra.mxu2 %v417_v24 }
  0x32   :  { %195 = vmatpush.bf16.msra.mxu1 %v408_v11 }
  0x34   :  { %278 = vmatpush.bf16.msra.mxu2 %v416_v25 }
  0x96   :  { %v114_v18 = vpop.f32.mrf.mxu0 }
  0x97   :  { %v115_v19 = vadd.f32 %v432_v17, %v114_v18 }
  0x99   :  { %435 = vtanh.f32 %v115_v19 }
  0x9e   :  { %v116_v20 = vpop.f32.mrf.mxu0 }
  0x9f   :  { %v436_v21 = vpop.eup %435 }
  0xa0   :  { %v119_v22 = vpack.c.bf16 %v436_v21, %v436_v21 }
  0xa2   :  { %196 = vmatmul.bf16.vlgmr.msra.gmra.mxu1 %v119_v22 }
 0x11f   :  { %v197_v27 = vpop.f32.mrf.mxu1 }
 0x120   :  { %v198_v28 = vadd.f32 %v433_v26, %v197_v27 }
 0x122   :  { %437 = vtanh.f32 %v198_v28 }
 0x127   :  { %v199_v29 = vpop.f32.mrf.mxu1 }
 0x128   :  { %v438_v30 = vpop.eup %437 }
 0x129   :  { %v202_v31 = vpack.c.bf16 %v438_v30, %v438_v30 }
 0x12b   :  { %279 = vmatmul.bf16.vlgmr.msra.gmra.mxu2 %v202_v31 }
 0x1ae   :  { %v280_v33 = vpop.f32.mrf.mxu2 }
 0x1af   :  { %v281_v34 = vadd.f32 %v434_v32, %v280_v33 }
 0x1b1   :  { %v291_v35 = vrot.slane %v281_v34, 4 }
 0x1b3   :  { %v292_v36 = vmax.f32 %v281_v34, %v291_v35 }
 0x1b5   :  { %v293_v37 = vrot.slane %v292_v36, 2 }
 0x1b6   :  { %v282_v38 = vpop.f32.mrf.mxu2 }
 0x1b7   :  { %v294_v39 = vmax.f32 %v292_v36, %v293_v37 }
 0x1b9   :  { %v295_v40 = vrot.slane %v294_v39, 1 }
 0x1bb   :  { %v296_v41 = vmax.f32 %v294_v39, %v295_v40 }
 0x1bd   :  { %v297_v42 = vsub.f32 %v281_v34, %v296_v41  ;;  %306 = vst [vmem:[#allocation10] sm:$0x1] %v296_v41 }
 0x1be   :  { %318 = dma.vmem_to_hbm [thread:$0]  %s314_s4, 16, %s316_s9, [#allocation4]  }
 0x1bf   :  { %v298_v43 = vmul.f32 1.442695, %v297_v42 }
 0x1c1   :  { %439 = vpow2.f32 %v298_v43 }
 0x1c7   :  { %v440_v44 = vpop.eup %439 }
 0x1c8   :  { %v300_v45 = vrot.slane %v440_v44, 4 }
 0x1ca   :  { %v301_v46 = vadd.f32 %v440_v44, %v300_v45 }
 0x1cc   :  { %v302_v47 = vrot.slane %v301_v46, 2 }
 0x1ce   :  { %v303_v48 = vadd.f32 %v302_v47, %v301_v46 }
 0x1d0   :  { %v304_v49 = vrot.slane %v303_v48, 1 }
 0x1d2   :  { %v305_v50 = vadd.f32 %v304_v49, %v303_v48 }
 0x1d4   :  { %307 = vst [vmem:[#allocation11] sm:$0x1] %v305_v50 }
 0x1d5   :  { %329 = dma.vmem_to_hbm [thread:$0]  %s325_s10, 16, %s327_s7, [#allocation12]  }
 0x1d6   :  { %591 = dma.done.wait [#allocation4], 16  }
 0x1d7   :  { %592 = vsyncadd [#allocation4], 4294967280 }
 0x1d8   :  { %593 = dma.done.wait [#allocation12], 16  }
 0x1d9   :  { %594 = vsyncadd [#allocation12], 4294967280 }
 0x1da   :  { %338 = vsyncpa [#allocation3], 1 }
 0x1db   :  { %339 = vsyncpa [#allocation6], 1 }
 0x1dc   :  { %340 = vsyncpa [#allocation9], 1 }
 0x1dd   :  { %341 = vsyncpa [#allocation4], 1 }
 0x1de   :  { %342 = vsyncpa [#allocation12], 1 }

</bundles_post_ra>
